<compile_context>
chip_gen: v7x
topology: tpu7x:2x2x1
jax: 0.10.0
libtpu: 0.0.40
codegen_flags: <defaults>
</compile_context>

<pallas_src>
import jax
import jax.numpy as jnp
from jax.experimental import pallas as pl
from jax.experimental.pallas import tpu as pltpu

_LANES = 128


# ---------------------------------------------------------------------------
# In-kernel helpers (elementwise over (TM, 128) tiles)
# ---------------------------------------------------------------------------
def _fast_recip(x):
    """EUP approx reciprocal + one Newton step (~f32 accuracy, no VALU divide)."""
    r = pl.reciprocal(x, approx=True)
    return r * (2.0 - x * r)


def _matrix_to_quaternion(m00, m01, m02, m10, m11, m12, m20, m21, m22):
    """pytorch3d matrix_to_quaternion (sqrt-positive-part + first-occurrence
    argmax candidate), restructured as select-then-divide."""
    qa0 = jnp.sqrt(jnp.maximum(1.0 + m00 + m11 + m22, 0.0))
    qa1 = jnp.sqrt(jnp.maximum(1.0 + m00 - m11 - m22, 0.0))
    qa2 = jnp.sqrt(jnp.maximum(1.0 - m00 + m11 - m22, 0.0))
    qa3 = jnp.sqrt(jnp.maximum(1.0 - m00 - m11 + m22, 0.0))

    # first-occurrence argmax over (qa0, qa1, qa2, qa3)
    sel0 = (qa0 >= qa1) & (qa0 >= qa2) & (qa0 >= qa3)
    sel1 = (~sel0) & (qa1 >= qa2) & (qa1 >= qa3)
    sel2 = (~sel0) & (~sel1) & (qa2 >= qa3)

    def pick(x0, x1, x2, x3):
        return jnp.where(sel0, x0, jnp.where(sel1, x1, jnp.where(sel2, x2, x3)))

    # shared off-diagonal sums / differences
    s21 = m21 - m12
    s02 = m02 - m20
    s10 = m10 - m01
    a10 = m10 + m01
    a02 = m02 + m20
    a12 = m12 + m21

    qa = pick(qa0, qa1, qa2, qa3)
    num_r = pick(qa0 * qa0, s21, s02, s10)
    num_i = pick(s21, qa1 * qa1, a10, a02)
    num_j = pick(s02, a10, qa2 * qa2, a12)
    num_k = pick(s10, a02, a12, qa3 * qa3)

    scale = _fast_recip(2.0 * jnp.maximum(qa, 0.1))
    return num_r * scale, num_i * scale, num_j * scale, num_k * scale


# ---------------------------------------------------------------------------
# Kernel body
# ---------------------------------------------------------------------------
def _scale_factor_loss_kernel(y_ref, p_ref, out_ref):
    """y_ref / p_ref: (12, TM, 128) component-major camera tiles.
    out_ref: (1, 8, 128) f32 partial-sum accumulator, resident across the
    reduction ("arbitrary") grid axis and indexed by the parallel axis."""

    @pl.when(pl.program_id(1) == 0)
    def _():
        out_ref[...] = jnp.zeros_like(out_ref)

    # --- ground truth rows of [R_gt | t] ---
    r00, r01, r02, t0 = y_ref[0], y_ref[1], y_ref[2], y_ref[3]
    r10, r11, r12, t1 = y_ref[4], y_ref[5], y_ref[6], y_ref[7]
    r20, r21, r22, t2 = y_ref[8], y_ref[9], y_ref[10], y_ref[11]

    # 3x3 inverse via adjugate / determinant (matches torch .inverse())
    c00 = r11 * r22 - r12 * r21
    c01 = r02 * r21 - r01 * r22
    c02 = r01 * r12 - r02 * r11
    c10 = r12 * r20 - r10 * r22
    c11 = r00 * r22 - r02 * r20
    c12 = r02 * r10 - r00 * r12
    c20 = r10 * r21 - r11 * r20
    c21 = r01 * r20 - r00 * r21
    c22 = r00 * r11 - r01 * r10
    det = r00 * c00 + r01 * c10 + r02 * c20
    inv_det = _fast_recip(det)

    # t_gt = -R_gt^{-1} @ t
    tg0 = -(c00 * t0 + c01 * t1 + c02 * t2) * inv_det
    tg1 = -(c10 * t0 + c11 * t1 + c12 * t2) * inv_det
    tg2 = -(c20 * t0 + c21 * t1 + c22 * t2) * inv_det

    # --- prediction rows of P_norm ---
    p00, p01, p02, pt0 = p_ref[0], p_ref[1], p_ref[2], p_ref[3]
    p10, p11, p12, pt1 = p_ref[4], p_ref[5], p_ref[6], p_ref[7]
    p20, p21, p22, pt2 = p_ref[8], p_ref[9], p_ref[10], p_ref[11]

    # ts = -R_pred^T @ t_pred   (contraction dim 3 -> stays on the VPU)
    ts0 = -(p00 * pt0 + p10 * pt1 + p20 * pt2)
    ts1 = -(p01 * pt0 + p11 * pt1 + p21 * pt2)
    ts2 = -(p02 * pt0 + p12 * pt1 + p22 * pt2)

    d0 = tg0 - ts0
    d1 = tg1 - ts1
    d2 = tg2 - ts2
    trans = jnp.sqrt(d0 * d0 + d1 * d1 + d2 * d2)

    qg = _matrix_to_quaternion(r00, r01, r02, r10, r11, r12, r20, r21, r22)
    qp = _matrix_to_quaternion(p00, p01, p02, p10, p11, p12, p20, p21, p22)
    dq0 = qp[0] - qg[0]
    dq1 = qp[1] - qg[1]
    dq2 = qp[2] - qg[2]
    dq3 = qp[3] - qg[3]
    rot = jnp.sqrt(dq0 * dq0 + dq1 * dq1 + dq2 * dq2 + dq3 * dq3)

    # fused per-sample loss, folded (TM,128) -> (8,128) with vector adds only
    per_sample = trans + rot                        # (TM, 128)
    tm = per_sample.shape[0]
    folded = per_sample[0:8, :]
    for i in range(1, tm // 8):
        folded = folded + per_sample[i * 8:(i + 1) * 8, :]
    out_ref[...] += folded[None, :, :]


# ---------------------------------------------------------------------------
# Wrapper
# ---------------------------------------------------------------------------
def scale_factor_loss(y, Ps_norm, *, max_sublane_tile=128):
    """ScaleFactorLoss.forward. y: (N,4,4) gt extrinsics, Ps_norm: (N,3,4).

    max_sublane_tile caps the number of 128-camera sublane rows per grid step
    (default 128 -> 16384 cameras / ~768 KiB per input block per buffer)."""
    n = y.shape[0]

    y34 = y[:, 0:3, :].astype(jnp.float32).reshape(n, 12)
    p34 = Ps_norm.astype(jnp.float32).reshape(n, 12)

    # batch -> (m, 128) lanes, m split over (parallel cores) x (steps) x TM
    m_raw = pl.cdiv(n, _LANES)
    tm = min(max_sublane_tile, ((m_raw + 7) // 8) * 8)        # multiple of 8
    tiles = pl.cdiv(m_raw, tm)
    n_cores = 2 if tiles >= 2 else 1     # v7x megacore split; sequential elsewhere
    tiles = pl.cdiv(tiles, n_cores) * n_cores
    steps = tiles // n_cores
    m_pad = tiles * tm
    n_pad = m_pad * _LANES

    pad = n_pad - n
    if pad:
        # identity-camera padding: contributes exactly 0 to both loss terms
        eye12 = jnp.array([1., 0., 0., 0.,
                           0., 1., 0., 0.,
                           0., 0., 1., 0.], dtype=jnp.float32)
        pad_block = jnp.broadcast_to(eye12, (pad, 12))
        y34 = jnp.concatenate([y34, pad_block], axis=0)
        p34 = jnp.concatenate([p34, pad_block], axis=0)

    # (n_pad, 12) -> (12, m_pad, 128): component-major, batch folded into the
    # sublane + lane axes so each component is a dense (TM, 128) vreg tile.
    # TODO(synk): for HBM-bound deployments feed inputs already in this layout
    # (or mask the tail in-kernel) to avoid the extra wrapper passes over HBM.
    y_slab = jnp.transpose(y34.reshape(m_pad, _LANES, 12), (2, 0, 1))
    p_slab = jnp.transpose(p34.reshape(m_pad, _LANES, 12), (2, 0, 1))

    block = (12, tm, _LANES)
    in_map = lambda c, s: (0, c * steps + s, 0)

    partials = pl.pallas_call(
        _scale_factor_loss_kernel,
        out_shape=jax.ShapeDtypeStruct((n_cores, 8, _LANES), jnp.float32),
        grid=(n_cores, steps),
        in_specs=[pl.BlockSpec(block, in_map),
                  pl.BlockSpec(block, in_map)],
        out_specs=pl.BlockSpec((1, 8, _LANES), lambda c, s: (c, 0, 0)),
        compiler_params=pltpu.CompilerParams(
            dimension_semantics=("parallel", "arbitrary")),
    )(y_slab, p_slab)

    # tiny final reduction (n_cores * 8 * 128 floats) + mean scaling
    return jnp.sum(partials) * (1.0 / n)


# ---------------------------------------------------------------------------
# Pure-JAX reference (sanity check only)
# ---------------------------------------------------------------------------
def _ref_matrix_to_quaternion(m):
    m00, m01, m02 = m[:, 0, 0], m[:, 0, 1], m[:, 0, 2]
    m10, m11, m12 = m[:, 1, 0], m[:, 1, 1], m[:, 1, 2]
    m20, m21, m22 = m[:, 2, 0], m[:, 2, 1], m[:, 2, 2]
    q_abs = jnp.sqrt(jnp.maximum(jnp.stack([
        1.0 + m00 + m11 + m22,
        1.0 + m00 - m11 - m22,
        1.0 - m00 + m11 - m22,
        1.0 - m00 - m11 + m22], axis=-1), 0.0))
    quat_by_rijk = jnp.stack([
        jnp.stack([q_abs[:, 0] ** 2, m21 - m12, m02 - m20, m10 - m01], axis=-1),
        jnp.stack([m21 - m12, q_abs[:, 1] ** 2, m10 + m01, m02 + m20], axis=-1),
        jnp.stack([m02 - m20, m10 + m01, q_abs[:, 2] ** 2, m12 + m21], axis=-1),
        jnp.stack([m10 - m01, m02 + m20, m12 + m21, q_abs[:, 3] ** 2], axis=-1),
    ], axis=-2)
    cand = quat_by_rijk / (2.0 * jnp.maximum(q_abs, 0.1)[..., None])
    idx = jnp.argmax(q_abs, axis=-1)
    return jnp.take_along_axis(cand, idx[:, None, None], axis=-2)[:, 0, :]


def _ref_loss(y, Ps):
    R_gt = y[:, 0:3, 0:3]
    t_gt = -jnp.einsum('nij,nj->ni', jnp.linalg.inv(R_gt), y[:, 0:3, 3])
    Rp = Ps[:, 0:3, 0:3]
    ts = -jnp.einsum('nji,nj->ni', Rp, Ps[:, 0:3, 3])
    trans = jnp.mean(jnp.linalg.norm(t_gt - ts, axis=1))
    rot = jnp.mean(jnp.linalg.norm(
        _ref_matrix_to_quaternion(Rp) - _ref_matrix_to_quaternion(R_gt), axis=1))
    return trans + rot


def _random_rotations(key, n):
    q = jax.random.normal(key, (n, 4), dtype=jnp.float32)
    q = q / jnp.linalg.norm(q, axis=-1, keepdims=True)
    r, i, j, k = q[:, 0], q[:, 1], q[:, 2], q[:, 3]
    return jnp.stack([
        jnp.stack([1 - 2 * (j * j + k * k), 2 * (i * j - k * r), 2 * (i * k + j * r)], -1),
        jnp.stack([2 * (i * j + k * r), 1 - 2 * (i * i + k * k), 2 * (j * k - i * r)], -1),
        jnp.stack([2 * (i * k - j * r), 2 * (j * k + i * r), 1 - 2 * (i * i + j * j)], -1),
    ], axis=-2)


def _make_inputs(key, n):
    k1, k2, k3, k4 = jax.random.split(key, 4)
    R_gt = _random_rotations(k1, n)
    t_gt = jax.random.normal(k2, (n, 3), dtype=jnp.float32)
    y = jnp.zeros((n, 4, 4), dtype=jnp.float32)
    y = y.at[:, 0:3, 0:3].set(R_gt)
    y = y.at[:, 0:3, 3].set(t_gt)
    y = y.at[:, 3, 3].set(1.0)
    R_pr = _random_rotations(k3, n)
    t_pr = jax.random.normal(k4, (n, 3), dtype=jnp.float32)
    Ps_norm = jnp.concatenate([R_pr, t_pr[:, :, None]], axis=-1)   # (N, 3, 4)
    return y, Ps_norm


if __name__ == "__main__":
    key = jax.random.PRNGKey(0)
    k_small, k_big = jax.random.split(key, 2)

    # small batch: single grid step
    y, Ps = _make_inputs(k_small, 8)
    loss = jax.block_until_ready(scale_factor_loss(y, Ps))
    ref = jax.block_until_ready(_ref_loss(y, Ps))
    assert jnp.allclose(loss, ref, rtol=2e-4, atol=2e-4), (loss, ref)

    # larger batch with a tiny tile so the multi-step grid, the 2-way parallel
    # axis and the identity-padding tail are all exercised
    y2, Ps2 = _make_inputs(k_big, 2500)
    loss2 = jax.block_until_ready(scale_factor_loss(y2, Ps2, max_sublane_tile=8))
    ref2 = jax.block_until_ready(_ref_loss(y2, Ps2))
    assert jnp.allclose(loss2, ref2, rtol=2e-4, atol=2e-4), (loss2, ref2)

    print("KERNEL_OK")
</pallas_src>

<mosaic_0001>
module attributes {stable_mosaic.version = 11 : i64} {
  func.func @_scale_factor_loss_kernel(%arg0: i32, %arg1: i32, %arg2: memref<12x8x128xf32, #tpu.memory_space<vmem>>, %arg3: memref<12x8x128xf32, #tpu.memory_space<vmem>>, %arg4: memref<1x8x128xf32, #tpu.memory_space<vmem>>) attributes {dimension_semantics = [#tpu.dimension_semantics<parallel>, #tpu.dimension_semantics<arbitrary>], iteration_bounds = array<i64: 1, 1>, scalar_prefetch = 0 : i64, scratch_operands = 0 : i64, tpu.core_type = #tpu.core_type<tc>, window_params = [{transform_indices = @transform_0, window_bounds = array<i64: 12, 8, 128>}, {transform_indices = @transform_1, window_bounds = array<i64: 12, 8, 128>}, {transform_indices = @transform_2, window_bounds = array<i64: 1, 8, 128>}]} {
    %c0_i32 = arith.constant 0 : i32
    %0 = arith.cmpi eq, %arg1, %c0_i32 : i32
    %1 = arith.extui %0 : i1 to i32
    %c0_i32_0 = arith.constant 0 : i32
    %2 = arith.cmpi ne, %1, %c0_i32_0 : i32
    scf.if %2 {
      %cst_101 = arith.constant 0.000000e+00 : f32
      %321 = vector.broadcast %cst_101 : f32 to vector<1x8x128xf32>
      %c0_102 = arith.constant 0 : index
      %c0_103 = arith.constant 0 : index
      %c0_104 = arith.constant 0 : index
      %322 = vector.load %arg4[%c0_102, %c0_103, %c0_104] : memref<1x8x128xf32, #tpu.memory_space<vmem>>, vector<1x8x128xf32>
      tpu.vector_store %arg4[%c0_102, %c0_103, %c0_104], %321 {strides = array<i32>} : memref<1x8x128xf32, #tpu.memory_space<vmem>>, vector<1x8x128xf32>,
    } else {
    }
    %c0 = arith.constant 0 : index
    %c0_1 = arith.constant 0 : index
    %c0_2 = arith.constant 0 : index
    %3 = vector.load %arg2[%c0, %c0_1, %c0_2] : memref<12x8x128xf32, #tpu.memory_space<vmem>>, vector<1x8x128xf32>
    %4 = vector.shape_cast %3 : vector<1x8x128xf32> to vector<8x128xf32>
    %c1 = arith.constant 1 : index
    %c0_3 = arith.constant 0 : index
    %c0_4 = arith.constant 0 : index
    %5 = vector.load %arg2[%c1, %c0_3, %c0_4] : memref<12x8x128xf32, #tpu.memory_space<vmem>>, vector<1x8x128xf32>
    %6 = vector.shape_cast %5 : vector<1x8x128xf32> to vector<8x128xf32>
    %c2 = arith.constant 2 : index
    %c0_5 = arith.constant 0 : index
    %c0_6 = arith.constant 0 : index
    %7 = vector.load %arg2[%c2, %c0_5, %c0_6] : memref<12x8x128xf32, #tpu.memory_space<vmem>>, vector<1x8x128xf32>
    %8 = vector.shape_cast %7 : vector<1x8x128xf32> to vector<8x128xf32>
    %c3 = arith.constant 3 : index
    %c0_7 = arith.constant 0 : index
    %c0_8 = arith.constant 0 : index
    %9 = vector.load %arg2[%c3, %c0_7, %c0_8] : memref<12x8x128xf32, #tpu.memory_space<vmem>>, vector<1x8x128xf32>
    %10 = vector.shape_cast %9 : vector<1x8x128xf32> to vector<8x128xf32>
    %c4 = arith.constant 4 : index
    %c0_9 = arith.constant 0 : index
    %c0_10 = arith.constant 0 : index
    %11 = vector.load %arg2[%c4, %c0_9, %c0_10] : memref<12x8x128xf32, #tpu.memory_space<vmem>>, vector<1x8x128xf32>
    %12 = vector.shape_cast %11 : vector<1x8x128xf32> to vector<8x128xf32>
    %c5 = arith.constant 5 : index
    %c0_11 = arith.constant 0 : index
    %c0_12 = arith.constant 0 : index
    %13 = vector.load %arg2[%c5, %c0_11, %c0_12] : memref<12x8x128xf32, #tpu.memory_space<vmem>>, vector<1x8x128xf32>
    %14 = vector.shape_cast %13 : vector<1x8x128xf32> to vector<8x128xf32>
    %c6 = arith.constant 6 : index
    %c0_13 = arith.constant 0 : index
    %c0_14 = arith.constant 0 : index
    %15 = vector.load %arg2[%c6, %c0_13, %c0_14] : memref<12x8x128xf32, #tpu.memory_space<vmem>>, vector<1x8x128xf32>
    %16 = vector.shape_cast %15 : vector<1x8x128xf32> to vector<8x128xf32>
    %c7 = arith.constant 7 : index
    %c0_15 = arith.constant 0 : index
    %c0_16 = arith.constant 0 : index
    %17 = vector.load %arg2[%c7, %c0_15, %c0_16] : memref<12x8x128xf32, #tpu.memory_space<vmem>>, vector<1x8x128xf32>
    %18 = vector.shape_cast %17 : vector<1x8x128xf32> to vector<8x128xf32>
    %c8 = arith.constant 8 : index
    %c0_17 = arith.constant 0 : index
    %c0_18 = arith.constant 0 : index
    %19 = vector.load %arg2[%c8, %c0_17, %c0_18] : memref<12x8x128xf32, #tpu.memory_space<vmem>>, vector<1x8x128xf32>
    %20 = vector.shape_cast %19 : vector<1x8x128xf32> to vector<8x128xf32>
    %c9 = arith.constant 9 : index
    %c0_19 = arith.constant 0 : index
    %c0_20 = arith.constant 0 : index
    %21 = vector.load %arg2[%c9, %c0_19, %c0_20] : memref<12x8x128xf32, #tpu.memory_space<vmem>>, vector<1x8x128xf32>
    %22 = vector.shape_cast %21 : vector<1x8x128xf32> to vector<8x128xf32>
    %c10 = arith.constant 10 : index
    %c0_21 = arith.constant 0 : index
    %c0_22 = arith.constant 0 : index
    %23 = vector.load %arg2[%c10, %c0_21, %c0_22] : memref<12x8x128xf32, #tpu.memory_space<vmem>>, vector<1x8x128xf32>
    %24 = vector.shape_cast %23 : vector<1x8x128xf32> to vector<8x128xf32>
    %c11 = arith.constant 11 : index
    %c0_23 = arith.constant 0 : index
    %c0_24 = arith.constant 0 : index
    %25 = vector.load %arg2[%c11, %c0_23, %c0_24] : memref<12x8x128xf32, #tpu.memory_space<vmem>>, vector<1x8x128xf32>
    %26 = vector.shape_cast %25 : vector<1x8x128xf32> to vector<8x128xf32>
    %27 = arith.mulf %14, %24 : vector<8x128xf32>
    %28 = arith.mulf %16, %22 : vector<8x128xf32>
    %29 = arith.subf %27, %28 : vector<8x128xf32>
    %30 = arith.mulf %8, %22 : vector<8x128xf32>
    %31 = arith.mulf %6, %24 : vector<8x128xf32>
    %32 = arith.subf %30, %31 : vector<8x128xf32>
    %33 = arith.mulf %6, %16 : vector<8x128xf32>
    %34 = arith.mulf %8, %14 : vector<8x128xf32>
    %35 = arith.subf %33, %34 : vector<8x128xf32>
    %36 = arith.mulf %16, %20 : vector<8x128xf32>
    %37 = arith.mulf %12, %24 : vector<8x128xf32>
    %38 = arith.subf %36, %37 : vector<8x128xf32>
    %39 = arith.mulf %4, %24 : vector<8x128xf32>
    %40 = arith.mulf %8, %20 : vector<8x128xf32>
    %41 = arith.subf %39, %40 : vector<8x128xf32>
    %42 = arith.mulf %8, %12 : vector<8x128xf32>
    %43 = arith.mulf %4, %16 : vector<8x128xf32>
    %44 = arith.subf %42, %43 : vector<8x128xf32>
    %45 = arith.mulf %12, %22 : vector<8x128xf32>
    %46 = arith.mulf %14, %20 : vector<8x128xf32>
    %47 = arith.subf %45, %46 : vector<8x128xf32>
    %48 = arith.mulf %6, %20 : vector<8x128xf32>
    %49 = arith.mulf %4, %22 : vector<8x128xf32>
    %50 = arith.subf %48, %49 : vector<8x128xf32>
    %51 = arith.mulf %4, %14 : vector<8x128xf32>
    %52 = arith.mulf %6, %12 : vector<8x128xf32>
    %53 = arith.subf %51, %52 : vector<8x128xf32>
    %54 = arith.mulf %4, %29 : vector<8x128xf32>
    %55 = arith.mulf %6, %38 : vector<8x128xf32>
    %56 = arith.addf %54, %55 : vector<8x128xf32>
    %57 = arith.mulf %8, %47 : vector<8x128xf32>
    %58 = arith.addf %56, %57 : vector<8x128xf32>
    %59 = tpu.reciprocal %58 {approx = true} : vector<8x128xf32> -> vector<8x128xf32>
    %60 = arith.mulf %58, %59 : vector<8x128xf32>
    %cst = arith.constant 2.000000e+00 : f32
    %61 = vector.broadcast %cst : f32 to vector<8x128xf32>
    %62 = arith.subf %61, %60 : vector<8x128xf32>
    %63 = arith.mulf %59, %62 : vector<8x128xf32>
    %64 = arith.mulf %29, %10 : vector<8x128xf32>
    %65 = arith.mulf %32, %18 : vector<8x128xf32>
    %66 = arith.addf %64, %65 : vector<8x128xf32>
    %67 = arith.mulf %35, %26 : vector<8x128xf32>
    %68 = arith.addf %66, %67 : vector<8x128xf32>
    %cst_25 = arith.constant 0.000000e+00 : f32
    %69 = vector.broadcast %cst_25 : f32 to vector<8x128xf32>
    %70 = arith.subf %69, %68 : vector<8x128xf32>
    %71 = arith.mulf %70, %63 : vector<8x128xf32>
    %72 = arith.mulf %38, %10 : vector<8x128xf32>
    %73 = arith.mulf %41, %18 : vector<8x128xf32>
    %74 = arith.addf %72, %73 : vector<8x128xf32>
    %75 = arith.mulf %44, %26 : vector<8x128xf32>
    %76 = arith.addf %74, %75 : vector<8x128xf32>
    %cst_26 = arith.constant 0.000000e+00 : f32
    %77 = vector.broadcast %cst_26 : f32 to vector<8x128xf32>
    %78 = arith.subf %77, %76 : vector<8x128xf32>
    %79 = arith.mulf %78, %63 : vector<8x128xf32>
    %80 = arith.mulf %47, %10 : vector<8x128xf32>
    %81 = arith.mulf %50, %18 : vector<8x128xf32>
    %82 = arith.addf %80, %81 : vector<8x128xf32>
    %83 = arith.mulf %53, %26 : vector<8x128xf32>
    %84 = arith.addf %82, %83 : vector<8x128xf32>
    %cst_27 = arith.constant 0.000000e+00 : f32
    %85 = vector.broadcast %cst_27 : f32 to vector<8x128xf32>
    %86 = arith.subf %85, %84 : vector<8x128xf32>
    %87 = arith.mulf %86, %63 : vector<8x128xf32>
    %c0_28 = arith.constant 0 : index
    %c0_29 = arith.constant 0 : index
    %c0_30 = arith.constant 0 : index
    %88 = vector.load %arg3[%c0_28, %c0_29, %c0_30] : memref<12x8x128xf32, #tpu.memory_space<vmem>>, vector<1x8x128xf32>
    %89 = vector.shape_cast %88 : vector<1x8x128xf32> to vector<8x128xf32>
    %c1_31 = arith.constant 1 : index
    %c0_32 = arith.constant 0 : index
    %c0_33 = arith.constant 0 : index
    %90 = vector.load %arg3[%c1_31, %c0_32, %c0_33] : memref<12x8x128xf32, #tpu.memory_space<vmem>>, vector<1x8x128xf32>
    %91 = vector.shape_cast %90 : vector<1x8x128xf32> to vector<8x128xf32>
    %c2_34 = arith.constant 2 : index
    %c0_35 = arith.constant 0 : index
    %c0_36 = arith.constant 0 : index
    %92 = vector.load %arg3[%c2_34, %c0_35, %c0_36] : memref<12x8x128xf32, #tpu.memory_space<vmem>>, vector<1x8x128xf32>
    %93 = vector.shape_cast %92 : vector<1x8x128xf32> to vector<8x128xf32>
    %c3_37 = arith.constant 3 : index
    %c0_38 = arith.constant 0 : index
    %c0_39 = arith.constant 0 : index
    %94 = vector.load %arg3[%c3_37, %c0_38, %c0_39] : memref<12x8x128xf32, #tpu.memory_space<vmem>>, vector<1x8x128xf32>
    %95 = vector.shape_cast %94 : vector<1x8x128xf32> to vector<8x128xf32>
    %c4_40 = arith.constant 4 : index
    %c0_41 = arith.constant 0 : index
    %c0_42 = arith.constant 0 : index
    %96 = vector.load %arg3[%c4_40, %c0_41, %c0_42] : memref<12x8x128xf32, #tpu.memory_space<vmem>>, vector<1x8x128xf32>
    %97 = vector.shape_cast %96 : vector<1x8x128xf32> to vector<8x128xf32>
    %c5_43 = arith.constant 5 : index
    %c0_44 = arith.constant 0 : index
    %c0_45 = arith.constant 0 : index
    %98 = vector.load %arg3[%c5_43, %c0_44, %c0_45] : memref<12x8x128xf32, #tpu.memory_space<vmem>>, vector<1x8x128xf32>
    %99 = vector.shape_cast %98 : vector<1x8x128xf32> to vector<8x128xf32>
    %c6_46 = arith.constant 6 : index
    %c0_47 = arith.constant 0 : index
    %c0_48 = arith.constant 0 : index
    %100 = vector.load %arg3[%c6_46, %c0_47, %c0_48] : memref<12x8x128xf32, #tpu.memory_space<vmem>>, vector<1x8x128xf32>
    %101 = vector.shape_cast %100 : vector<1x8x128xf32> to vector<8x128xf32>
    %c7_49 = arith.constant 7 : index
    %c0_50 = arith.constant 0 : index
    %c0_51 = arith.constant 0 : index
    %102 = vector.load %arg3[%c7_49, %c0_50, %c0_51] : memref<12x8x128xf32, #tpu.memory_space<vmem>>, vector<1x8x128xf32>
    %103 = vector.shape_cast %102 : vector<1x8x128xf32> to vector<8x128xf32>
    %c8_52 = arith.constant 8 : index
    %c0_53 = arith.constant 0 : index
    %c0_54 = arith.constant 0 : index
    %104 = vector.load %arg3[%c8_52, %c0_53, %c0_54] : memref<12x8x128xf32, #tpu.memory_space<vmem>>, vector<1x8x128xf32>
    %105 = vector.shape_cast %104 : vector<1x8x128xf32> to vector<8x128xf32>
    %c9_55 = arith.constant 9 : index
    %c0_56 = arith.constant 0 : index
    %c0_57 = arith.constant 0 : index
    %106 = vector.load %arg3[%c9_55, %c0_56, %c0_57] : memref<12x8x128xf32, #tpu.memory_space<vmem>>, vector<1x8x128xf32>
    %107 = vector.shape_cast %106 : vector<1x8x128xf32> to vector<8x128xf32>
    %c10_58 = arith.constant 10 : index
    %c0_59 = arith.constant 0 : index
    %c0_60 = arith.constant 0 : index
    %108 = vector.load %arg3[%c10_58, %c0_59, %c0_60] : memref<12x8x128xf32, #tpu.memory_space<vmem>>, vector<1x8x128xf32>
    %109 = vector.shape_cast %108 : vector<1x8x128xf32> to vector<8x128xf32>
    %c11_61 = arith.constant 11 : index
    %c0_62 = arith.constant 0 : index
    %c0_63 = arith.constant 0 : index
    %110 = vector.load %arg3[%c11_61, %c0_62, %c0_63] : memref<12x8x128xf32, #tpu.memory_space<vmem>>, vector<1x8x128xf32>
    %111 = vector.shape_cast %110 : vector<1x8x128xf32> to vector<8x128xf32>
    %112 = arith.mulf %89, %95 : vector<8x128xf32>
    %113 = arith.mulf %97, %103 : vector<8x128xf32>
    %114 = arith.addf %112, %113 : vector<8x128xf32>
    %115 = arith.mulf %105, %111 : vector<8x128xf32>
    %116 = arith.addf %114, %115 : vector<8x128xf32>
    %cst_64 = arith.constant 0.000000e+00 : f32
    %117 = vector.broadcast %cst_64 : f32 to vector<8x128xf32>
    %118 = arith.subf %117, %116 : vector<8x128xf32>
    %119 = arith.mulf %91, %95 : vector<8x128xf32>
    %120 = arith.mulf %99, %103 : vector<8x128xf32>
    %121 = arith.addf %119, %120 : vector<8x128xf32>
    %122 = arith.mulf %107, %111 : vector<8x128xf32>
    %123 = arith.addf %121, %122 : vector<8x128xf32>
    %cst_65 = arith.constant 0.000000e+00 : f32
    %124 = vector.broadcast %cst_65 : f32 to vector<8x128xf32>
    %125 = arith.subf %124, %123 : vector<8x128xf32>
    %126 = arith.mulf %93, %95 : vector<8x128xf32>
    %127 = arith.mulf %101, %103 : vector<8x128xf32>
    %128 = arith.addf %126, %127 : vector<8x128xf32>
    %129 = arith.mulf %109, %111 : vector<8x128xf32>
    %130 = arith.addf %128, %129 : vector<8x128xf32>
    %cst_66 = arith.constant 0.000000e+00 : f32
    %131 = vector.broadcast %cst_66 : f32 to vector<8x128xf32>
    %132 = arith.subf %131, %130 : vector<8x128xf32>
    %133 = arith.subf %71, %118 : vector<8x128xf32>
    %134 = arith.subf %79, %125 : vector<8x128xf32>
    %135 = arith.subf %87, %132 : vector<8x128xf32>
    %136 = arith.mulf %133, %133 : vector<8x128xf32>
    %137 = arith.mulf %134, %134 : vector<8x128xf32>
    %138 = arith.addf %136, %137 : vector<8x128xf32>
    %139 = arith.mulf %135, %135 : vector<8x128xf32>
    %140 = arith.addf %138, %139 : vector<8x128xf32>
    %141 = math.sqrt %140 : vector<8x128xf32>
    %cst_67 = arith.constant 1.000000e+00 : f32
    %142 = vector.broadcast %cst_67 : f32 to vector<8x128xf32>
    %143 = arith.addf %142, %4 : vector<8x128xf32>
    %144 = arith.addf %143, %14 : vector<8x128xf32>
    %145 = arith.addf %144, %24 : vector<8x128xf32>
    %cst_68 = arith.constant 0.000000e+00 : f32
    %146 = vector.broadcast %cst_68 : f32 to vector<8x128xf32>
    %147 = arith.maximumf %145, %146 : vector<8x128xf32>
    %148 = math.sqrt %147 : vector<8x128xf32>
    %cst_69 = arith.constant 1.000000e+00 : f32
    %149 = vector.broadcast %cst_69 : f32 to vector<8x128xf32>
    %150 = arith.addf %149, %4 : vector<8x128xf32>
    %151 = arith.subf %150, %14 : vector<8x128xf32>
    %152 = arith.subf %151, %24 : vector<8x128xf32>
    %cst_70 = arith.constant 0.000000e+00 : f32
    %153 = vector.broadcast %cst_70 : f32 to vector<8x128xf32>
    %154 = arith.maximumf %152, %153 : vector<8x128xf32>
    %155 = math.sqrt %154 : vector<8x128xf32>
    %cst_71 = arith.constant 1.000000e+00 : f32
    %156 = vector.broadcast %cst_71 : f32 to vector<8x128xf32>
    %157 = arith.subf %156, %4 : vector<8x128xf32>
    %158 = arith.addf %157, %14 : vector<8x128xf32>
    %159 = arith.subf %158, %24 : vector<8x128xf32>
    %cst_72 = arith.constant 0.000000e+00 : f32
    %160 = vector.broadcast %cst_72 : f32 to vector<8x128xf32>
    %161 = arith.maximumf %159, %160 : vector<8x128xf32>
    %162 = math.sqrt %161 : vector<8x128xf32>
    %cst_73 = arith.constant 1.000000e+00 : f32
    %163 = vector.broadcast %cst_73 : f32 to vector<8x128xf32>
    %164 = arith.subf %163, %4 : vector<8x128xf32>
    %165 = arith.subf %164, %14 : vector<8x128xf32>
    %166 = arith.addf %165, %24 : vector<8x128xf32>
    %cst_74 = arith.constant 0.000000e+00 : f32
    %167 = vector.broadcast %cst_74 : f32 to vector<8x128xf32>
    %168 = arith.maximumf %166, %167 : vector<8x128xf32>
    %169 = math.sqrt %168 : vector<8x128xf32>
    %170 = arith.cmpf oge, %148, %155 : vector<8x128xf32>
    %171 = arith.cmpf oge, %148, %162 : vector<8x128xf32>
    %172 = arith.andi %170, %171 : vector<8x128xi1>
    %173 = arith.cmpf oge, %148, %169 : vector<8x128xf32>
    %174 = arith.andi %172, %173 : vector<8x128xi1>
    %cst_75 = arith.constant dense<true> : vector<8x128xi1>
    %175 = arith.xori %174, %cst_75 : vector<8x128xi1>
    %176 = arith.cmpf oge, %155, %162 : vector<8x128xf32>
    %177 = arith.andi %175, %176 : vector<8x128xi1>
    %178 = arith.cmpf oge, %155, %169 : vector<8x128xf32>
    %179 = arith.andi %177, %178 : vector<8x128xi1>
    %cst_76 = arith.constant dense<true> : vector<8x128xi1>
    %180 = arith.xori %174, %cst_76 : vector<8x128xi1>
    %cst_77 = arith.constant dense<true> : vector<8x128xi1>
    %181 = arith.xori %179, %cst_77 : vector<8x128xi1>
    %182 = arith.andi %180, %181 : vector<8x128xi1>
    %183 = arith.cmpf oge, %162, %169 : vector<8x128xf32>
    %184 = arith.andi %182, %183 : vector<8x128xi1>
    %185 = arith.subf %22, %16 : vector<8x128xf32>
    %186 = arith.subf %8, %20 : vector<8x128xf32>
    %187 = arith.subf %12, %6 : vector<8x128xf32>
    %188 = arith.addf %12, %6 : vector<8x128xf32>
    %189 = arith.addf %8, %20 : vector<8x128xf32>
    %190 = arith.addf %16, %22 : vector<8x128xf32>
    %191 = arith.select %184, %162, %169 : vector<8x128xi1>, vector<8x128xf32>
    %192 = arith.select %179, %155, %191 : vector<8x128xi1>, vector<8x128xf32>
    %193 = arith.select %174, %148, %192 : vector<8x128xi1>, vector<8x128xf32>
    %194 = arith.mulf %148, %148 : vector<8x128xf32>
    %195 = arith.select %184, %186, %187 : vector<8x128xi1>, vector<8x128xf32>
    %196 = arith.select %179, %185, %195 : vector<8x128xi1>, vector<8x128xf32>
    %197 = arith.select %174, %194, %196 : vector<8x128xi1>, vector<8x128xf32>
    %198 = arith.mulf %155, %155 : vector<8x128xf32>
    %199 = arith.select %184, %188, %189 : vector<8x128xi1>, vector<8x128xf32>
    %200 = arith.select %179, %198, %199 : vector<8x128xi1>, vector<8x128xf32>
    %201 = arith.select %174, %185, %200 : vector<8x128xi1>, vector<8x128xf32>
    %202 = arith.mulf %162, %162 : vector<8x128xf32>
    %203 = arith.select %184, %202, %190 : vector<8x128xi1>, vector<8x128xf32>
    %204 = arith.select %179, %188, %203 : vector<8x128xi1>, vector<8x128xf32>
    %205 = arith.select %174, %186, %204 : vector<8x128xi1>, vector<8x128xf32>
    %206 = arith.mulf %169, %169 : vector<8x128xf32>
    %207 = arith.select %184, %190, %206 : vector<8x128xi1>, vector<8x128xf32>
    %208 = arith.select %179, %189, %207 : vector<8x128xi1>, vector<8x128xf32>
    %209 = arith.select %174, %187, %208 : vector<8x128xi1>, vector<8x128xf32>
    %cst_78 = arith.constant 1.000000e-01 : f32
    %210 = vector.broadcast %cst_78 : f32 to vector<8x128xf32>
    %211 = arith.maximumf %193, %210 : vector<8x128xf32>
    %cst_79 = arith.constant 2.000000e+00 : f32
    %212 = vector.broadcast %cst_79 : f32 to vector<8x128xf32>
    %213 = arith.mulf %212, %211 : vector<8x128xf32>
    %214 = tpu.reciprocal %213 {approx = true} : vector<8x128xf32> -> vector<8x128xf32>
    %215 = arith.mulf %213, %214 : vector<8x128xf32>
    %cst_80 = arith.constant 2.000000e+00 : f32
    %216 = vector.broadcast %cst_80 : f32 to vector<8x128xf32>
    %217 = arith.subf %216, %215 : vector<8x128xf32>
    %218 = arith.mulf %214, %217 : vector<8x128xf32>
    %219 = arith.mulf %197, %218 : vector<8x128xf32>
    %220 = arith.mulf %201, %218 : vector<8x128xf32>
    %221 = arith.mulf %205, %218 : vector<8x128xf32>
    %222 = arith.mulf %209, %218 : vector<8x128xf32>
    %cst_81 = arith.constant 1.000000e+00 : f32
    %223 = vector.broadcast %cst_81 : f32 to vector<8x128xf32>
    %224 = arith.addf %223, %89 : vector<8x128xf32>
    %225 = arith.addf %224, %99 : vector<8x128xf32>
    %226 = arith.addf %225, %109 : vector<8x128xf32>
    %cst_82 = arith.constant 0.000000e+00 : f32
    %227 = vector.broadcast %cst_82 : f32 to vector<8x128xf32>
    %228 = arith.maximumf %226, %227 : vector<8x128xf32>
    %229 = math.sqrt %228 : vector<8x128xf32>
    %cst_83 = arith.constant 1.000000e+00 : f32
    %230 = vector.broadcast %cst_83 : f32 to vector<8x128xf32>
    %231 = arith.addf %230, %89 : vector<8x128xf32>
    %232 = arith.subf %231, %99 : vector<8x128xf32>
    %233 = arith.subf %232, %109 : vector<8x128xf32>
    %cst_84 = arith.constant 0.000000e+00 : f32
    %234 = vector.broadcast %cst_84 : f32 to vector<8x128xf32>
    %235 = arith.maximumf %233, %234 : vector<8x128xf32>
    %236 = math.sqrt %235 : vector<8x128xf32>
    %cst_85 = arith.constant 1.000000e+00 : f32
    %237 = vector.broadcast %cst_85 : f32 to vector<8x128xf32>
    %238 = arith.subf %237, %89 : vector<8x128xf32>
    %239 = arith.addf %238, %99 : vector<8x128xf32>
    %240 = arith.subf %239, %109 : vector<8x128xf32>
    %cst_86 = arith.constant 0.000000e+00 : f32
    %241 = vector.broadcast %cst_86 : f32 to vector<8x128xf32>
    %242 = arith.maximumf %240, %241 : vector<8x128xf32>
    %243 = math.sqrt %242 : vector<8x128xf32>
    %cst_87 = arith.constant 1.000000e+00 : f32
    %244 = vector.broadcast %cst_87 : f32 to vector<8x128xf32>
    %245 = arith.subf %244, %89 : vector<8x128xf32>
    %246 = arith.subf %245, %99 : vector<8x128xf32>
    %247 = arith.addf %246, %109 : vector<8x128xf32>
    %cst_88 = arith.constant 0.000000e+00 : f32
    %248 = vector.broadcast %cst_88 : f32 to vector<8x128xf32>
    %249 = arith.maximumf %247, %248 : vector<8x128xf32>
    %250 = math.sqrt %249 : vector<8x128xf32>
    %251 = arith.cmpf oge, %229, %236 : vector<8x128xf32>
    %252 = arith.cmpf oge, %229, %243 : vector<8x128xf32>
    %253 = arith.andi %251, %252 : vector<8x128xi1>
    %254 = arith.cmpf oge, %229, %250 : vector<8x128xf32>
    %255 = arith.andi %253, %254 : vector<8x128xi1>
    %cst_89 = arith.constant dense<true> : vector<8x128xi1>
    %256 = arith.xori %255, %cst_89 : vector<8x128xi1>
    %257 = arith.cmpf oge, %236, %243 : vector<8x128xf32>
    %258 = arith.andi %256, %257 : vector<8x128xi1>
    %259 = arith.cmpf oge, %236, %250 : vector<8x128xf32>
    %260 = arith.andi %258, %259 : vector<8x128xi1>
    %cst_90 = arith.constant dense<true> : vector<8x128xi1>
    %261 = arith.xori %255, %cst_90 : vector<8x128xi1>
    %cst_91 = arith.constant dense<true> : vector<8x128xi1>
    %262 = arith.xori %260, %cst_91 : vector<8x128xi1>
    %263 = arith.andi %261, %262 : vector<8x128xi1>
    %264 = arith.cmpf oge, %243, %250 : vector<8x128xf32>
    %265 = arith.andi %263, %264 : vector<8x128xi1>
    %266 = arith.subf %107, %101 : vector<8x128xf32>
    %267 = arith.subf %93, %105 : vector<8x128xf32>
    %268 = arith.subf %97, %91 : vector<8x128xf32>
    %269 = arith.addf %97, %91 : vector<8x128xf32>
    %270 = arith.addf %93, %105 : vector<8x128xf32>
    %271 = arith.addf %101, %107 : vector<8x128xf32>
    %272 = arith.select %265, %243, %250 : vector<8x128xi1>, vector<8x128xf32>
    %273 = arith.select %260, %236, %272 : vector<8x128xi1>, vector<8x128xf32>
    %274 = arith.select %255, %229, %273 : vector<8x128xi1>, vector<8x128xf32>
    %275 = arith.mulf %229, %229 : vector<8x128xf32>
    %276 = arith.select %265, %267, %268 : vector<8x128xi1>, vector<8x128xf32>
    %277 = arith.select %260, %266, %276 : vector<8x128xi1>, vector<8x128xf32>
    %278 = arith.select %255, %275, %277 : vector<8x128xi1>, vector<8x128xf32>
    %279 = arith.mulf %236, %236 : vector<8x128xf32>
    %280 = arith.select %265, %269, %270 : vector<8x128xi1>, vector<8x128xf32>
    %281 = arith.select %260, %279, %280 : vector<8x128xi1>, vector<8x128xf32>
    %282 = arith.select %255, %266, %281 : vector<8x128xi1>, vector<8x128xf32>
    %283 = arith.mulf %243, %243 : vector<8x128xf32>
    %284 = arith.select %265, %283, %271 : vector<8x128xi1>, vector<8x128xf32>
    %285 = arith.select %260, %269, %284 : vector<8x128xi1>, vector<8x128xf32>
    %286 = arith.select %255, %267, %285 : vector<8x128xi1>, vector<8x128xf32>
    %287 = arith.mulf %250, %250 : vector<8x128xf32>
    %288 = arith.select %265, %271, %287 : vector<8x128xi1>, vector<8x128xf32>
    %289 = arith.select %260, %270, %288 : vector<8x128xi1>, vector<8x128xf32>
    %290 = arith.select %255, %268, %289 : vector<8x128xi1>, vector<8x128xf32>
    %cst_92 = arith.constant 1.000000e-01 : f32
    %291 = vector.broadcast %cst_92 : f32 to vector<8x128xf32>
    %292 = arith.maximumf %274, %291 : vector<8x128xf32>
    %cst_93 = arith.constant 2.000000e+00 : f32
    %293 = vector.broadcast %cst_93 : f32 to vector<8x128xf32>
    %294 = arith.mulf %293, %292 : vector<8x128xf32>
    %295 = tpu.reciprocal %294 {approx = true} : vector<8x128xf32> -> vector<8x128xf32>
    %296 = arith.mulf %294, %295 : vector<8x128xf32>
    %cst_94 = arith.constant 2.000000e+00 : f32
    %297 = vector.broadcast %cst_94 : f32 to vector<8x128xf32>
    %298 = arith.subf %297, %296 : vector<8x128xf32>
    %299 = arith.mulf %295, %298 : vector<8x128xf32>
    %300 = arith.mulf %278, %299 : vector<8x128xf32>
    %301 = arith.mulf %282, %299 : vector<8x128xf32>
    %302 = arith.mulf %286, %299 : vector<8x128xf32>
    %303 = arith.mulf %290, %299 : vector<8x128xf32>
    %304 = arith.subf %300, %219 : vector<8x128xf32>
    %305 = arith.subf %301, %220 : vector<8x128xf32>
    %306 = arith.subf %302, %221 : vector<8x128xf32>
    %307 = arith.subf %303, %222 : vector<8x128xf32>
    %308 = arith.mulf %304, %304 : vector<8x128xf32>
    %309 = arith.mulf %305, %305 : vector<8x128xf32>
    %310 = arith.addf %308, %309 : vector<8x128xf32>
    %311 = arith.mulf %306, %306 : vector<8x128xf32>
    %312 = arith.addf %310, %311 : vector<8x128xf32>
    %313 = arith.mulf %307, %307 : vector<8x128xf32>
    %314 = arith.addf %312, %313 : vector<8x128xf32>
    %315 = math.sqrt %314 : vector<8x128xf32>
    %316 = arith.addf %141, %315 : vector<8x128xf32>
    %c0_95 = arith.constant 0 : index
    %c0_96 = arith.constant 0 : index
    %c0_97 = arith.constant 0 : index
    %317 = vector.load %arg4[%c0_95, %c0_96, %c0_97] : memref<1x8x128xf32, #tpu.memory_space<vmem>>, vector<1x8x128xf32>
    %318 = vector.shape_cast %316 : vector<8x128xf32> to vector<1x8x128xf32>
    %319 = arith.addf %317, %318 : vector<1x8x128xf32>
    %c0_98 = arith.constant 0 : index
    %c0_99 = arith.constant 0 : index
    %c0_100 = arith.constant 0 : index
    %320 = vector.load %arg4[%c0_98, %c0_99, %c0_100] : memref<1x8x128xf32, #tpu.memory_space<vmem>>, vector<1x8x128xf32>
    tpu.vector_store %arg4[%c0_98, %c0_99, %c0_100], %319 {strides = array<i32>} : memref<1x8x128xf32, #tpu.memory_space<vmem>>, vector<1x8x128xf32>,
    return
  }
  func.func @transform_0(%arg0: i32, %arg1: i32) -> (i32, i32, i32) {
    %c1_i32 = arith.constant 1 : i32
    %0 = arith.muli %arg0, %c1_i32 : i32
    %1 = arith.addi %0, %arg1 : i32
    %c0_i32 = arith.constant 0 : i32
    %c0_i32_0 = arith.constant 0 : i32
    %c0_i32_1 = arith.constant 0 : i32
    return %c0_i32, %1, %c0_i32_0 : i32, i32, i32
  }
  func.func @transform_1(%arg0: i32, %arg1: i32) -> (i32, i32, i32) {
    %c1_i32 = arith.constant 1 : i32
    %0 = arith.muli %arg0, %c1_i32 : i32
    %1 = arith.addi %0, %arg1 : i32
    %c0_i32 = arith.constant 0 : i32
    %c0_i32_0 = arith.constant 0 : i32
    %c0_i32_1 = arith.constant 0 : i32
    return %c0_i32, %1, %c0_i32_0 : i32, i32, i32
  }
  func.func @transform_2(%arg0: i32, %arg1: i32) -> (i32, i32, i32) {
    %c0_i32 = arith.constant 0 : i32
    %c0_i32_0 = arith.constant 0 : i32
    %c0_i32_1 = arith.constant 0 : i32
    return %arg0, %c0_i32, %c0_i32_0 : i32, i32, i32
  }
}

</mosaic_0001>

<bundles_post_ra>
// kernel: tpu_custom_call.1
= control target key start
LH: loop header
LB: loop body
LE: loop exit
PB: predicated region body
PF: predicated region fallthrough
CT: control target
= control target key end

     0   :  { %7 = vsyncpa [#allocation3], 0  ;;  %s963_s0 = inlined_call_operand.hbm [shape: f32[12,8,128], index: 0, kind: input, shape index: {}]   ;;  %s964_s1 = inlined_call_operand.hbm [shape: f32[12,8,128], index: 1, kind: input, shape index: {}]   ;;  %s965_s2 = inlined_call_operand.hbm [shape: f32[1,8,128], index: 2, kind: output, shape index: {}]  }
   0x1   :  { %8 = vsyncpa [#allocation6], 0 }
   0x2   :  { %9 = vsyncpa [#allocation4], 0  ;;  %s514_s9 = smov [#allocation2]   ;;  %s442_s13 = scalar_lea.hbm %s963_s0, 1536 }
   0x3   :  { %s18_s10 = sshll.u32 %s514_s9, 4  ;;  %p443_p0 = scmp.ne.s32.totalorder %s963_s0, %s442_s13  ;;  %s19_s10 = int_to_ptr.vmem [resolvable:$true] %s18_s10 }
   0x4   :  { %p446_p1 = scmp.lt.u32.totalorder %s442_s13, %s963_s0 }
   0x6   :  { %p448_p2 = pnand %p446_p1, %p443_p0 }
   0x8   :  { %451 = shalt.err (!%p448_p2)
}
   0x9   :  { %s452_s18 = scalar_lea.vmem %s19_s10, 1536  ;;  %p457_p4 = scmp.lt.s32.totalorder %s19_s10, %s19_s10 }
   0xa   :  { %p453_p3 = scmp.ne.s32.totalorder %s19_s10, %s452_s18  ;;  %p458_p5 = scmp.lt.s32.totalorder %s452_s18, %s452_s18 }
   0xc   :  { %p459_p6 = por %p458_p5, %p457_p4 }
   0xe   :  { %p460_p7 = pnand %p459_p6, %p453_p3 }
  0x10   :  { %463 = shalt.err (!%p460_p7)
}
  0x11   :  { %s515_s19 = smov 128   ;;  %s516_s20 = smov 8  }
  0x12   :  { %24 = dma.hbm_to_vmem [thread:$0]  %s963_s0, 1536, %s19_s10, [#allocation3], %s515_s19, %s515_s19, %s516_s20  }
  0x13   :  { %s517_s23 = smov [#allocation5]   ;;  %s464_s27 = scalar_lea.hbm %s964_s1, 1536 }
  0x14   :  { %s33_s24 = sshll.u32 %s517_s23, 4  ;;  %p465_p8 = scmp.ne.s32.totalorder %s964_s1, %s464_s27  ;;  %s34_s24 = int_to_ptr.vmem [resolvable:$true] %s33_s24 }
  0x15   :  { %p468_p9 = scmp.lt.u32.totalorder %s464_s27, %s964_s1 }
  0x17   :  { %p470_p10 = pnand %p468_p9, %p465_p8 }
  0x19   :  { %473 = shalt.err (!%p470_p10)
}
  0x1a   :  { %s474_s4 = scalar_lea.vmem %s34_s24, 1536  ;;  %p479_p12 = scmp.lt.s32.totalorder %s34_s24, %s34_s24 }
  0x1b   :  { %p475_p11 = scmp.ne.s32.totalorder %s34_s24, %s474_s4  ;;  %p480_p13 = scmp.lt.s32.totalorder %s474_s4, %s474_s4 }
  0x1d   :  { %p481_p0 = por %p480_p13, %p479_p12 }
  0x1f   :  { %p482_p1 = pnand %p481_p0, %p475_p11 }
  0x21   :  { %485 = shalt.err (!%p482_p1)
}
  0x22   :  { %39 = dma.hbm_to_vmem [thread:$0]  %s964_s1, 1536, %s34_s24, [#allocation6], %s515_s19, %s515_s19, %s516_s20  }
  0x23   :  { %508 = dma.done.wait [#allocation3], 1536  }
  0x24   :  { %509 = vsyncadd [#allocation3], 4294965760 }
  0x25   :  { %510 = dma.done.wait [#allocation6], 1536  }
  0x26   :  { %511 = vsyncadd [#allocation6], 4294965760  ;;  %v559_v0 = vld [vmem:[#allocation2] sm:$0xff]  ;;  %v562_v2 = vld [vmem:[#allocation2 + $0x28] sm:$0xff]  ;;  %vm518_vm15 = vmmov 1   ;;  %s519_s1 = smov [#allocation7]  }
  0x27   :  { %v189_v1 = vadd.f32 1.0, %v559_v0  ;;  %v210_v3 = vsub.f32 1.0, %v559_v0  ;;  %v565_v4 = vld [vmem:[#allocation2 + $0x50] sm:$0xff]  ;;  %v574_v11 = vld [vmem:[#allocation2 + $0x48] sm:$0xff]  ;;  %v578_v14 = vld [vmem:[#allocation2 + $0x20] sm:$0xff]  ;;  %s399_s6 = sshll.u32 %s519_s1, 4  ;;  %s400_s6 = int_to_ptr.vmem [resolvable:$true] %s399_s6 }
  0x28   :  { %v572_v10 = vld [vmem:[#allocation2 + $0x30] sm:$0xff]  ;;  %v580_v15 = vld [vmem:[#allocation2 + $0x40] sm:$0xff]  ;;  %v76_v20 = vmul.f32 %v565_v4, %v562_v2  ;;  %v86_v23 = vmul.f32 %v565_v4, %v578_v14  ;;  %v596_v25 = vld [vmem:[#allocation5 + $0x28] sm:$0xff]  ;;  %v94_v31 = vmul.f32 %v574_v11, %v578_v14  ;;  %s486_s7 = scalar_lea.vmem %s400_s6, 128  ;;  %p491_p3 = scmp.lt.s32.totalorder %s400_s6, %s400_s6 }
  0x29   :  { %v190_v5 = vadd.f32 %v189_v1, %v562_v2  ;;  %v200_v6 = vsub.f32 %v189_v1, %v562_v2  ;;  %v211_v7 = vadd.f32 %v210_v3, %v562_v2  ;;  %v221_v9 = vsub.f32 %v210_v3, %v562_v2  ;;  %v593_v24 = vld [vmem:[#allocation5] sm:$0xff]  ;;  %v608_v33 = vld [vmem:[#allocation5 + $0x50] sm:$0xff]  ;;  %v610_v34 = vld [vmem:[#allocation2 + $0x8] sm:$0xff]  ;;  %p487_p2 = scmp.ne.s32.totalorder %s400_s6, %s486_s7  ;;  %p492_p4 = scmp.lt.s32.totalorder %s486_s7, %s486_s7 }
  0x2a   :  { %v77_v21 = vmul.f32 %v574_v11, %v572_v10  ;;  %v85_v22 = vmul.f32 %v580_v15, %v572_v10  ;;  %v280_v28 = vadd.f32 1.0, %v593_v24  ;;  %v301_v29 = vsub.f32 1.0, %v593_v24  ;;  %v645_v3 = vld [vmem:[#allocation2 + $0x10] sm:$0xff] }
  0x2b   :  { %v191_v8 = vadd.f32 %v190_v5, %v565_v4  ;;  %v201_v12 = vsub.f32 %v200_v6, %v565_v4  ;;  %v212_v13 = vsub.f32 %v211_v7, %v565_v4  ;;  %v222_v19 = vadd.f32 %v221_v9, %v565_v4  ;;  %p493_p5 = por %p492_p4, %p491_p3 }
  0x2c   :  { %v598_v27 = vsub.f32 %v76_v20, %v77_v21  ;;  %v602_v30 = vsub.f32 %v85_v22, %v86_v23  ;;  %v95_v32 = vmul.f32 %v580_v15, %v562_v2  ;;  %v281_v35 = vadd.f32 %v280_v28, %v596_v25 }
  0x2d   :  { %v192_v16 = vmax.f32 %v191_v8, 0.0  ;;  %v202_v17 = vmax.f32 %v201_v12, 0.0  ;;  %v582_v18 = vmax.f32 %v212_v13, 0.0  ;;  %v223_v26 = vmax.f32 %v222_v19, 0.0  ;;  %p494_p6 = pnand %p493_p5, %p487_p2 }
  0x2e   :  { %v291_v36 = vsub.f32 %v280_v28, %v596_v25  ;;  %v282_v37 = vadd.f32 %v281_v35, %v608_v33  ;;  %v302_v39 = vadd.f32 %v301_v29, %v596_v25  ;;  %v617_v40 = vsub.f32 %v94_v31, %v95_v32 }
  0x2f   :  { %416 = vrsqrt.f32 %v192_v16  ;;  %v103_v41 = vmul.f32 %v598_v27, %v559_v0  ;;  %v104_v42 = vmul.f32 %v602_v30, %v610_v34  ;;  %vm195_vm0 = vcmp.eq.f32.partialorder %v192_v16, inf }
  0x30   :  { %418 = vrsqrt.f32 %v202_v17  ;;  %v292_v38 = vsub.f32 %v291_v36, %v608_v33  ;;  %vm197_vm1 = vcmp.eq.f32.partialorder %v192_v16, 0.0  ;;  %v198_v44 = vand.u32 2147483648, %v192_v16 }
  0x31   :  { %420 = vrsqrt.f32 %v582_v18  ;;  %v623_v45 = vmax.f32 %v282_v37, 0.0  ;;  %vm205_vm2 = vcmp.eq.f32.partialorder %v202_v17, inf  ;;  %v208_v48 = vand.u32 2147483648, %v202_v17 }
  0x32   :  { %422 = vrsqrt.f32 %v223_v26  ;;  %v625_v49 = vmax.f32 %v292_v38, 0.0  ;;  %vm207_vm3 = vcmp.eq.f32.partialorder %v202_v17, 0.0  ;;  %v303_v52 = vsub.f32 %v302_v39, %v608_v33 }
  0x33   :  { %424 = vrsqrt.f32 %v623_v45  ;;  %vm216_vm4 = vcmp.eq.f32.partialorder %v582_v18, inf  ;;  %vm218_vm5 = vcmp.eq.f32.partialorder %v582_v18, 0.0  ;;  %v219_v54 = vand.u32 2147483648, %v582_v18 }
  0x34   :  { %v312_v58 = vsub.f32 %v301_v29, %v596_v25  ;;  %vm226_vm6 = vcmp.eq.f32.partialorder %v223_v26, inf  ;;  %v229_v61 = vand.u32 2147483648, %v223_v26  ;;  %426 = vrsqrt.f32 %v625_v49 }
  0x35   :  { %v643_v1 = vmax.f32 %v303_v52, 0.0  ;;  %vm228_vm8 = vcmp.eq.f32.partialorder %v223_v26, 0.0  ;;  %v105_v8 = vadd.f32 %v104_v42, %v103_v41  ;;  %v106_v9 = vmul.f32 %v617_v40, %v645_v3 }
  0x36   :  { %v313_v7 = vadd.f32 %v312_v58, %v608_v33  ;;  %v685_v21 = vmul.f32 %v562_v2, %v645_v3  ;;  %v689_v22 = vmul.f32 %v578_v14, %v645_v3  ;;  %v700_v28 = vmul.f32 %v572_v10, %v610_v34 }
  0x37   :  { %428 = vrsqrt.f32 %v643_v1  ;;  %v678_v19 = vadd.f32 %v106_v9, %v105_v8  ;;  %v704_v29 = vmul.f32 %v562_v2, %v559_v0  ;;  %v79_v32 = vmul.f32 %v574_v11, %v645_v3  ;;  %v75_v8 = vld [vmem:[#allocation2 + $0x58] sm:$0xff] }
  0x38   :  { %v80_v35 = vmul.f32 %v565_v4, %v610_v34  ;;  %v89_v36 = vmul.f32 %v580_v15, %v645_v3  ;;  %v88_v2 = vmul.f32 %v565_v4, %v559_v0  ;;  %v97_v37 = vmul.f32 %v580_v15, %v610_v34 }
  0x39   :  { %v417_v43 = vpop.eup %416  ;;  %v289_v39 = vand.u32 2147483648, %v623_v45  ;;  %v299_v42 = vand.u32 2147483648, %v625_v49 }
  0x3a   :  { %v419_v46 = vpop.eup %418  ;;  %v194_v47 = vmul.f32 %v417_v43, %v192_v16 }
  0x3b   :  { %v421_v50 = vpop.eup %420  ;;  %v204_v51 = vmul.f32 %v419_v46, %v202_v17 }
  0x3c   :  { %v196_v53 = vsel %vm195_vm0, %v192_v16, %v194_v47  ;;  %v215_v57 = vmul.f32 %v421_v50, %v582_v18  ;;  %v423_v59 = vpop.eup %422  ;;  %v84_v50 = vsub.f32 %v700_v28, %v685_v21  ;;  %v139_v28 = vld [vmem:[#allocation5 + $0x18] sm:$0xff] }
  0x3d   :  { %v633_v55 = vsel %vm197_vm1, %v198_v44, %v196_v53  ;;  %v206_v56 = vsel %vm205_vm2, %v202_v17, %v204_v51  ;;  %v225_v63 = vmul.f32 %v423_v59, %v223_v26  ;;  %v425_v13 = vpop.eup %424  ;;  %v669_v17 = vmax.f32 %v313_v7, 0.0  ;;  %v67_v59 = vld [vmem:[#allocation2 + $0x38] sm:$0xff] }
  0x3e   :  { %v637_v60 = vsel %vm207_vm3, %v208_v48, %v206_v56  ;;  %v217_v62 = vsel %vm216_vm4, %v582_v18, %v215_v57  ;;  %v427_v20 = vpop.eup %426  ;;  %v98_v44 = vmul.f32 %v574_v11, %v559_v0  ;;  %v81_v48 = vsub.f32 %v79_v32, %v80_v35 }
  0x3f   :  { %vm231_vm7 = vcmp.ge.f32.partialorder %v633_v55, %v637_v60  ;;  %v649_v5 = vsel %vm218_vm5, %v219_v54, %v217_v62  ;;  %v227_v6 = vsel %vm226_vm6, %v223_v26, %v225_v63  ;;  %430 = vrsqrt.f32 %v669_v17  ;;  %v59_v54 = vld [vmem:[#allocation2 + $0x18] sm:$0xff] }
  0x40   :  { %vm232_vm9 = vcmp.ge.f32.partialorder %v633_v55, %v649_v5  ;;  %v656_v12 = vsel %vm228_vm8, %v229_v61, %v227_v6  ;;  %vm237_vm12 = vcmp.ge.f32.partialorder %v637_v60, %v649_v5  ;;  %v285_v26 = vmul.f32 %v425_v13, %v623_v45 }
  0x41   :  { %vm233_vm10 = vmand %vm231_vm7, %vm232_vm9  ;;  %vm234_vm11 = vcmp.ge.f32.partialorder %v633_v55, %v656_v12  ;;  %vm239_vm14 = vcmp.ge.f32.partialorder %v637_v60, %v656_v12  ;;  %vm243_vm3 = vcmp.ge.f32.partialorder %v649_v5, %v656_v12  ;;  %vm286_vm5 = vcmp.eq.f32.partialorder %v623_v45, inf  ;;  %v429_v43 = vpop.eup %428 }
  0x42   :  { %vm663_vm13 = vmand %vm233_vm10, %vm234_vm11  ;;  %v295_v31 = vmul.f32 %v427_v20, %v625_v49  ;;  %vm296_vm7 = vcmp.eq.f32.partialorder %v625_v49, inf  ;;  %432 = vrcp.f32 %v678_v19  ;;  %v287_v4 = vsel %vm286_vm5, %v623_v45, %v285_v26 }
  0x43   :  { %vm674_vm0 = vmxor %vm663_vm13, %vm518_vm15  ;;  %vm288_vm9 = vcmp.eq.f32.partialorder %v623_v45, 0.0  ;;  %vm298_vm10 = vcmp.eq.f32.partialorder %v625_v49, 0.0  ;;  %v92_v45 = vmul.f32 %v572_v10, %v559_v0  ;;  %v101_v51 = vmul.f32 %v578_v14, %v610_v34 }
  0x44   :  { %vm238_vm1 = vmand %vm674_vm0, %vm237_vm12  ;;  %v297_v47 = vsel %vm296_vm7, %v625_v49, %v295_v31  ;;  %v756_v53 = vsel %vm288_vm9, %v289_v39, %v287_v4  ;;  %vm307_vm11 = vcmp.eq.f32.partialorder %v643_v1, inf  ;;  %v310_v49 = vand.u32 2147483648, %v643_v1  ;;  %v777_v31 = vld [vmem:[#allocation5 + $0x20] sm:$0xff] }
  0x45   :  { %vm691_vm2 = vmand %vm238_vm1, %vm239_vm14  ;;  %v90_v56 = vsub.f32 %v88_v2, %v89_v36  ;;  %v760_v57 = vsel %vm298_vm10, %v299_v42, %v297_v47  ;;  %v306_v58 = vmul.f32 %v429_v43, %v643_v1  ;;  %vm309_vm12 = vcmp.eq.f32.partialorder %v643_v1, 0.0  ;;  %v785_v36 = vld [vmem:[#allocation5 + $0x8] sm:$0xff]  ;;  %v155_v42 = vld [vmem:[#allocation5 + $0x58] sm:$0xff] }
  0x46   :  { %vm241_vm4 = vmxor %vm691_vm2, %vm518_vm15  ;;  %v99_v61 = vsub.f32 %v97_v37, %v98_v44  ;;  %vm317_vm14 = vcmp.eq.f32.partialorder %v669_v17, inf  ;;  %v320_v62 = vand.u32 2147483648, %v669_v17  ;;  %vm322_vm1 = vcmp.ge.f32.partialorder %v756_v53, %v760_v57 }
  0x47   :  { %vm242_vm6 = vmand %vm674_vm0, %vm241_vm4  ;;  %vm319_vm0 = vcmp.eq.f32.partialorder %v669_v17, 0.0  ;;  %v308_v6 = vsel %vm307_vm11, %v643_v1, %v306_v58  ;;  %v93_v9 = vsub.f32 %v689_v22, %v92_v45  ;;  %v102_v13 = vsub.f32 %v704_v29, %v101_v51  ;;  %v147_v1 = vld [vmem:[#allocation5 + $0x38] sm:$0xff]  ;;  %v137_v45 = vld [vmem:[#allocation5 + $0x10] sm:$0xff] }
  0x48   :  { %vm728_vm8 = vmand %vm242_vm6, %vm243_vm3  ;;  %v112_v18 = vmul.f32 %v598_v27, %v59_v54  ;;  %v774_v20 = vsel %vm309_vm12, %v310_v49, %v308_v6  ;;  %v113_v21 = vmul.f32 %v81_v48, %v67_v59  ;;  %v119_v26 = vmul.f32 %v602_v30, %v59_v54  ;;  %v818_v51 = vld [vmem:[#allocation5 + $0x30] sm:$0xff] }
  0x49   :  { %v251_v41 = vsel %vm728_vm8, %v649_v5, %v656_v12  ;;  %v431_v0 = vpop.eup %430  ;;  %vm323_vm3 = vcmp.ge.f32.partialorder %v756_v53, %v774_v20  ;;  %v120_v29 = vmul.f32 %v90_v56, %v67_v59  ;;  %v126_v27 = vmul.f32 %v617_v40, %v59_v54  ;;  %v151_v54 = vld [vmem:[#allocation5 + $0x48] sm:$0xff] }
  0x4a   :  { %v252_v46 = vsel %vm691_vm2, %v637_v60, %v251_v41  ;;  %v316_v7 = vmul.f32 %v431_v0, %v669_v17  ;;  %v127_v35 = vmul.f32 %v99_v61, %v67_v59  ;;  %vm324_vm4 = vmand %vm322_vm1, %vm323_vm3  ;;  %vm328_vm6 = vcmp.ge.f32.partialorder %v760_v57, %v774_v20 }
  0x4b   :  { %v253_v52 = vsel %vm663_vm13, %v633_v55, %v252_v46  ;;  %v115_v40 = vmul.f32 %v84_v50, %v75_v8  ;;  %v156_v37 = vmul.f32 %v139_v28, %v593_v24  ;;  %v157_v39 = vmul.f32 %v147_v1, %v777_v31 }
  0x4c   :  { %v270_v63 = vmax.f32 %v253_v52, 0.1  ;;  %v318_v32 = vsel %vm317_vm14, %v669_v17, %v316_v7  ;;  %v433_v22 = vpop.eup %432  ;;  %v114_v4 = vadd.f32 %v113_v21, %v112_v18  ;;  %v162_v43 = vmul.f32 %v139_v28, %v785_v36 }
  0x4d   :  { %v789_v30 = vsel %vm319_vm0, %v320_v62, %v318_v32  ;;  %v109_v41 = vmul.f32 %v433_v22, %v678_v19  ;;  %v163_v44 = vmul.f32 %v147_v1, %v596_v25  ;;  %v121_v46 = vadd.f32 %v120_v29, %v119_v26  ;;  %v149_v25 = vld [vmem:[#allocation5 + $0x40] sm:$0xff] }
  0x4e   :  { %v794_v2 = vmul.f32 2.0, %v270_v63  ;;  %vm325_vm5 = vcmp.ge.f32.partialorder %v756_v53, %v789_v30  ;;  %vm330_vm9 = vcmp.ge.f32.partialorder %v760_v57, %v789_v30  ;;  %v122_v47 = vmul.f32 %v93_v9, %v75_v8 }
  0x4f   :  { %vm802_vm7 = vmand %vm324_vm4, %vm325_vm5  ;;  %v128_v48 = vadd.f32 %v127_v35, %v126_v27  ;;  %v129_v50 = vmul.f32 %v102_v13, %v75_v8  ;;  %v168_v19 = vmul.f32 %v139_v28, %v137_v45  ;;  %v169_v52 = vmul.f32 %v147_v1, %v818_v51 }
  0x50   :  { %vm814_vm10 = vmxor %vm802_vm7, %vm518_vm15  ;;  %434 = vrcp.f32 %v794_v2  ;;  %vm334_vm14 = vcmp.ge.f32.partialorder %v774_v20, %v789_v30  ;;  %v158_v56 = vadd.f32 %v157_v39, %v156_v37  ;;  %v159_v58 = vmul.f32 %v155_v42, %v149_v25 }
  0x51   :  { %vm329_vm11 = vmand %vm814_vm10, %vm328_vm6  ;;  %v110_v0 = vsub.f32 2.0, %v109_v41  ;;  %v116_v59 = vadd.f32 %v115_v40, %v114_v4  ;;  %v164_v61 = vadd.f32 %v163_v44, %v162_v43  ;;  %v165_v62 = vmul.f32 %v155_v42, %v151_v54 }
  0x52   :  { %vm830_vm12 = vmand %vm329_vm11, %vm330_vm9  ;;  %v123_v63 = vadd.f32 %v122_v47, %v121_v46  ;;  %v130_v7 = vadd.f32 %v129_v50, %v128_v48  ;;  %v170_v8 = vadd.f32 %v169_v52, %v168_v19  ;;  %v171_v9 = vmul.f32 %v155_v42, %v608_v33 }
  0x53   :  { %vm332_vm0 = vmxor %vm830_vm12, %vm518_vm15  ;;  %v160_v18 = vadd.f32 %v159_v58, %v158_v56  ;;  %v111_v26 = vmul.f32 %v433_v22, %v110_v0  ;;  %v117_v28 = vsub.f32 0.0, %v116_v59  ;;  %v166_v1 = vadd.f32 %v165_v62, %v164_v61 }
  0x54   :  { %vm333_vm1 = vmand %vm814_vm10, %vm332_vm0  ;;  %v124_v29 = vsub.f32 0.0, %v123_v63  ;;  %v131_v33 = vsub.f32 0.0, %v130_v7  ;;  %v172_v35 = vadd.f32 %v171_v9, %v170_v8  ;;  %v858_v37 = vsub.f32 %v574_v11, %v572_v10 }
  0x55   :  { %vm841_vm3 = vmand %vm333_vm1, %vm334_vm14  ;;  %v161_v40 = vsub.f32 0.0, %v160_v18  ;;  %v118_v4 = vmul.f32 %v117_v28, %v111_v26  ;;  %v167_v42 = vsub.f32 0.0, %v166_v1  ;;  %v862_v22 = vsub.f32 %v645_v3, %v580_v15 }
  0x56   :  { %v342_v13 = vsel %vm841_vm3, %v774_v20, %v789_v30  ;;  %v866_v43 = vsub.f32 %v578_v14, %v610_v34  ;;  %v125_v44 = vmul.f32 %v124_v29, %v111_v26  ;;  %v248_v24 = vadd.f32 %v578_v14, %v610_v34 }
  0x57   :  { %v343_v21 = vsel %vm830_vm12, %v760_v57, %v342_v13  ;;  %v249_v46 = vadd.f32 %v580_v15, %v645_v3  ;;  %v132_v47 = vmul.f32 %v131_v33, %v111_v26  ;;  %v173_v48 = vsub.f32 0.0, %v172_v35 }
  0x58   :  { %v344_v32 = vsel %vm802_vm7, %v756_v53, %v343_v21  ;;  %v250_v50 = vadd.f32 %v574_v11, %v572_v10  ;;  %v337_v19 = vsub.f32 %v137_v45, %v149_v25  ;;  %v262_v52 = vmul.f32 %v649_v5, %v649_v5 }
  0x59   :  { %v361_v27 = vmax.f32 %v344_v32, 0.1  ;;  %v266_v56 = vmul.f32 %v656_v12, %v656_v12  ;;  %v338_v14 = vsub.f32 %v777_v31, %v785_v36  ;;  %v174_v34 = vsub.f32 %v118_v4, %v161_v40 }
  0x5a   :  { %v435_v41 = vpop.eup %434  ;;  %v339_v15 = vadd.f32 %v777_v31, %v785_v36  ;;  %v340_v3 = vadd.f32 %v149_v25, %v137_v45  ;;  %v341_v0 = vadd.f32 %v151_v54, %v818_v51  ;;  %v175_v10 = vsub.f32 %v125_v44, %v167_v42 }
  0x5b   :  { %v362_v39 = vmul.f32 2.0, %v361_v27  ;;  %v273_v58 = vmul.f32 %v435_v41, %v794_v2  ;;  %v255_v11 = vsel %vm728_vm8, %v862_v22, %v866_v43  ;;  %v353_v5 = vmul.f32 %v774_v20, %v774_v20 }
  0x5c   :  { %v357_v12 = vmul.f32 %v789_v30, %v789_v30  ;;  %v176_v2 = vsub.f32 %v132_v47, %v173_v48  ;;  %v254_v59 = vmul.f32 %v633_v55, %v633_v55  ;;  %v258_v31 = vmul.f32 %v637_v60, %v637_v60 }
  0x5d   :  { %436 = vrcp.f32 %v362_v39  ;;  %v336_v36 = vsub.f32 %v151_v54, %v818_v51  ;;  %v259_v45 = vsel %vm728_vm8, %v248_v24, %v249_v46  ;;  %v263_v25 = vsel %vm728_vm8, %v262_v52, %v250_v50 }
  0x5e   :  { %v267_v20 = vsel %vm728_vm8, %v250_v50, %v266_v56  ;;  %v274_v61 = vsub.f32 2.0, %v273_v58  ;;  %v177_v30 = vmul.f32 %v174_v34, %v174_v34  ;;  %v256_v55 = vsel %vm691_vm2, %v858_v37, %v255_v11 }
  0x5f   :  { %v346_v60 = vsel %vm841_vm3, %v337_v19, %v338_v14  ;;  %v349_v51 = vmul.f32 %v760_v57, %v760_v57  ;;  %v178_v54 = vmul.f32 %v175_v10, %v175_v10  ;;  %v350_v62 = vsel %vm841_vm3, %v339_v15, %v340_v3 }
  0x60   :  { %v354_v38 = vsel %vm841_vm3, %v353_v5, %v341_v0  ;;  %v358_v63 = vsel %vm841_vm3, %v341_v0, %v357_v12  ;;  %v260_v7 = vsel %vm691_vm2, %v258_v31, %v259_v45  ;;  %v264_v8 = vsel %vm691_vm2, %v248_v24, %v263_v25 }
  0x61   :  { %v268_v9 = vsel %vm691_vm2, %v249_v46, %v267_v20  ;;  %v345_v57 = vmul.f32 %v756_v53, %v756_v53  ;;  %v180_v18 = vmul.f32 %v176_v2, %v176_v2  ;;  %v257_v21 = vsel %vm663_vm13, %v254_v59, %v256_v55 }
  0x62   :  { %v275_v26 = vmul.f32 %v435_v41, %v274_v61  ;;  %v347_v6 = vsel %vm830_vm12, %v336_v36, %v346_v60  ;;  %v351_v28 = vsel %vm830_vm12, %v349_v51, %v350_v62  ;;  %v355_v1 = vsel %vm830_vm12, %v339_v15, %v354_v38 }
  0x63   :  { %v359_v23 = vsel %vm830_vm12, %v340_v3, %v358_v63  ;;  %v179_v53 = vadd.f32 %v178_v54, %v177_v30  ;;  %v261_v29 = vsel %vm663_vm13, %v858_v37, %v260_v7  ;;  %v265_v27 = vsel %vm663_vm13, %v862_v22, %v264_v8 }
  0x64   :  { %v269_v33 = vsel %vm663_vm13, %v866_v43, %v268_v9  ;;  %v348_v35 = vsel %vm802_vm7, %v345_v57, %v347_v6  ;;  %v276_v49 = vmul.f32 %v275_v26, %v257_v21  ;;  %v356_v41 = vsel %vm802_vm7, %v337_v19, %v355_v1 }
  0x65   :  { %v360_v37 = vsel %vm802_vm7, %v338_v14, %v359_v23  ;;  %v277_v4 = vmul.f32 %v275_v26, %v261_v29  ;;  %v278_v42 = vmul.f32 %v275_v26, %v265_v27  ;;  %v279_v22 = vmul.f32 %v275_v26, %v269_v33 }
  0x66   :  { %v181_v16 = vadd.f32 %v180_v18, %v179_v53 }
  0x67   :  { %v437_v13 = vpop.eup %436 }
  0x68   :  { %v364_v32 = vmul.f32 %v437_v13, %v362_v39  ;;  %v352_v39 = vsel %vm802_vm7, %v336_v36, %v351_v28  ;;  %438 = vrsqrt.f32 %v181_v16  ;;  %vm184_vm13 = vcmp.eq.f32.partialorder %v181_v16, inf }
  0x69   :  { %v187_v11 = vand.u32 2147483648, %v181_v16  ;;  %vm186_vm15 = vcmp.eq.f32.partialorder %v181_v16, 0.0 }
  0x6a   :  { %v365_v40 = vsub.f32 2.0, %v364_v32 }
  0x6c   :  { %v366_v44 = vmul.f32 %v437_v13, %v365_v40 }
  0x6e   :  { %v367_v43 = vmul.f32 %v366_v44, %v348_v35  ;;  %v368_v24 = vmul.f32 %v366_v44, %v352_v39  ;;  %v369_v46 = vmul.f32 %v366_v44, %v356_v41  ;;  %v370_v47 = vmul.f32 %v366_v44, %v360_v37 }
  0x70   :  { %v371_v48 = vsub.f32 %v367_v43, %v276_v49  ;;  %v372_v50 = vsub.f32 %v368_v24, %v277_v4  ;;  %v373_v52 = vsub.f32 %v369_v46, %v278_v42  ;;  %v374_v56 = vsub.f32 %v370_v47, %v279_v22 }
  0x72   :  { %v375_v58 = vmul.f32 %v371_v48, %v371_v48  ;;  %v376_v34 = vmul.f32 %v372_v50, %v372_v50  ;;  %v378_v19 = vmul.f32 %v373_v52, %v373_v52  ;;  %v380_v17 = vmul.f32 %v374_v56, %v374_v56  ;;  %v439_v0 = vpop.eup %438 }
  0x73   :  { %v183_v10 = vmul.f32 %v439_v0, %v181_v16 }
  0x74   :  { %v377_v15 = vadd.f32 %v376_v34, %v375_v58 }
  0x75   :  { %v185_v5 = vsel %vm184_vm13, %v181_v16, %v183_v10 }
  0x76   :  { %v379_v14 = vadd.f32 %v378_v19, %v377_v15  ;;  %v188_v31 = vsel %vm186_vm15, %v187_v11, %v185_v5 }
  0x78   :  { %v381_v3 = vadd.f32 %v380_v17, %v379_v14 }
  0x7a   :  { %440 = vrsqrt.f32 %v381_v3  ;;  %vm384_vm2 = vcmp.eq.f32.partialorder %v381_v3, inf  ;;  %v387_v2 = vand.u32 2147483648, %v381_v3  ;;  %vm386_vm8 = vcmp.eq.f32.partialorder %v381_v3, 0.0 }
  0x84   :  { %v441_v12 = vpop.eup %440 }
  0x85   :  { %v383_v59 = vmul.f32 %v441_v12, %v381_v3 }
  0x87   :  { %v385_v36 = vsel %vm384_vm2, %v381_v3, %v383_v59 }
  0x88   :  { %v388_v45 = vsel %vm386_vm8, %v387_v2, %v385_v36 }
  0x89   :  { %v389_v25 = vadd.f32 %v388_v45, %v188_v31 }
  0x8b   :  { %392 = vst [vmem:[#allocation7] sm:$0xff] %v389_v25 }
  0x8c   :  { %497 = shalt.err (!%p494_p6)
}
  0x8d   :  { %s498_s10 = scalar_lea.hbm %s965_s2, 128 }
  0x8e   :  { %p499_p7 = scmp.ne.s32.totalorder %s965_s2, %s498_s10  ;;  %p502_p8 = scmp.lt.u32.totalorder %s498_s10, %s965_s2 }
  0x90   :  { %p504_p9 = pnand %p502_p8, %p499_p7 }
  0x92   :  { %507 = shalt.err (!%p504_p9)
}
  0x93   :  { %402 = dma.vmem_to_hbm [thread:$0]  %s400_s6, 128, %s965_s2, [#allocation4]  }
  0x94   :  { %512 = dma.done.wait [#allocation4], 128  }
  0x95   :  { %513 = vsyncadd [#allocation4], 4294967168 }
  0x96   :  { %406 = vsyncpa [#allocation3], 1 }
  0x97   :  { %407 = vsyncpa [#allocation6], 1 }
  0x98   :  { %408 = vsyncpa [#allocation4], 1 }

</bundles_post_ra>
